<compile_context>
chip_gen: v7x
topology: tpu7x:2x2x1
jax: 0.10.0
libtpu: 0.0.40
codegen_flags: <defaults>
</compile_context>

<pallas_src>
import functools

import jax
import jax.numpy as jnp
import numpy as np
from jax.experimental import pallas as pl
from jax.experimental.pallas import tpu as pltpu

EPS = 1e-5


# ---------------------------------------------------------------------------
# In-kernel helpers
# ---------------------------------------------------------------------------
def _im2col_k3(a):
    """(C, L) activation -> (3*C, L) im2col slab for a k=3, pad=1, stride=1 conv.

    Row block k holds the activation shifted so that slab[k*C + c, l] = a[c, l+k-1]
    (zero outside [0, L)).  Shifts are built with zero-column concatenation along the
    lane axis (pure jnp: valid in Mosaic and interpret mode).
    """
    C, L = a.shape
    z = jnp.zeros((C, 1), a.dtype)
    left = jnp.concatenate([z, a[:, : L - 1]], axis=1)    # slab row block 0: a[c, l-1]
    right = jnp.concatenate([a[:, 1:], z], axis=1)        # slab row block 2: a[c, l+1]
    return jnp.concatenate([left, a, right], axis=0)


def _groupnorm1_2d(x, gw, gb, inv_n):
    """GroupNorm(num_groups=1) on a (C, L) slice: single-pass mean/var + affine."""
    s = jnp.sum(x)
    q = jnp.sum(x * x)
    mean = s * inv_n
    var = q * inv_n - mean * mean            # biased variance (PyTorch GroupNorm)
    xn = (x - mean) * jax.lax.rsqrt(var + EPS)
    return xn * gw + gb


# ---------------------------------------------------------------------------
# Fused kernel: block1 -> block2 (+ scale/shift) -> residual
# ---------------------------------------------------------------------------
def _unpatcher_kernel(xu_ref, gn1w_ref, gn1b_ref, w1_ref, b1_ref,
                      gn2w_ref, gn2b_ref, scale_ref, shift_ref,
                      w2_ref, b2_ref, wo_ref, bo_ref, o_ref):
    # xu_ref   : (B, Cin, L)       o_ref : (B, Cout, L)
    # gn1w/gn1b: (Cin, 1)          gn2w/gn2b : (Cout, 1)
    # w1       : (Cout, 3*Cin)     w2 : (Cout, 3*Cout)     b1/b2 : (Cout, 1)
    # scale/shift : (B, Cout, 1)   wo : (Cout, Cin)        bo : (Cout, 1)
    B, Cin, L = xu_ref.shape
    Cout = o_ref.shape[1]

    # Hoist all parameter loads out of the batch loop.
    gn1w, gn1b = gn1w_ref[...], gn1b_ref[...]
    gn2w, gn2b = gn2w_ref[...], gn2b_ref[...]
    w1, b1 = w1_ref[...], b1_ref[...]
    w2, b2 = w2_ref[...], b2_ref[...]
    wo, bo = wo_ref[...], bo_ref[...]

    inv_n1 = 1.0 / float(Cin * L)
    inv_n2 = 1.0 / float(Cout * L)

    for b in range(B):                                   # static unroll (B is tiny)
        xv = xu_ref[b]                                   # (Cin, L)

        # ---- block1: GroupNorm(1) -> SiLU -> Conv1d(k=3, pad=1) ----
        xa = _groupnorm1_2d(xv, gn1w, gn1b, inv_n1)
        a1 = xa * jax.nn.sigmoid(xa)                     # SiLU
        h = jnp.dot(w1, _im2col_k3(a1),
                    preferred_element_type=jnp.float32) + b1      # (Cout, L)

        # ---- block2: GroupNorm(1) -> *(scale+1)+shift -> SiLU -> Conv1d(k=3) ----
        ha = _groupnorm1_2d(h, gn2w, gn2b, inv_n2)
        ha = ha * (scale_ref[b] + 1.0) + shift_ref[b]
        a2 = ha * jax.nn.sigmoid(ha)
        y = jnp.dot(w2, _im2col_k3(a2),
                    preferred_element_type=jnp.float32) + b2      # (Cout, L)

        # ---- to_out: 1x1 conv residual of xu (in_channels != out_channels) ----
        res = jnp.dot(wo, xv, preferred_element_type=jnp.float32) + bo

        o_ref[b] = y + res


# ---------------------------------------------------------------------------
# Wrappers
# ---------------------------------------------------------------------------
def _call_unpatcher(xu, scale, shift, prep):
    B, Cin, L = xu.shape
    Cout = prep["b1"].shape[0]
    KC1 = prep["w1"].shape[1]
    KC2 = prep["w2"].shape[1]

    return pl.pallas_call(
        _unpatcher_kernel,
        out_shape=jax.ShapeDtypeStruct((B, Cout, L), jnp.float32),
        grid_spec=pltpu.PrefetchScalarGridSpec(
            num_scalar_prefetch=0,
            grid=(1,),                                   # single grid step; batch handled in-kernel
            in_specs=[
                pl.BlockSpec((B, Cin, L), lambda i: (0, 0, 0)),     # xu
                pl.BlockSpec((Cin, 1), lambda i: (0, 0)),           # gn1_w
                pl.BlockSpec((Cin, 1), lambda i: (0, 0)),           # gn1_b
                pl.BlockSpec((Cout, KC1), lambda i: (0, 0)),        # w1 (im2col-stacked)
                pl.BlockSpec((Cout, 1), lambda i: (0, 0)),          # b1
                pl.BlockSpec((Cout, 1), lambda i: (0, 0)),          # gn2_w
                pl.BlockSpec((Cout, 1), lambda i: (0, 0)),          # gn2_b
                pl.BlockSpec((B, Cout, 1), lambda i: (0, 0, 0)),    # scale
                pl.BlockSpec((B, Cout, 1), lambda i: (0, 0, 0)),    # shift
                pl.BlockSpec((Cout, KC2), lambda i: (0, 0)),        # w2 (im2col-stacked)
                pl.BlockSpec((Cout, 1), lambda i: (0, 0)),          # b2
                pl.BlockSpec((Cout, Cin), lambda i: (0, 0)),        # wout (1x1 conv)
                pl.BlockSpec((Cout, 1), lambda i: (0, 0)),          # bout
            ],
            out_specs=pl.BlockSpec((B, Cout, L), lambda i: (0, 0, 0)),
        ),
        compiler_params=pltpu.CompilerParams(dimension_semantics=("arbitrary",)),
    )(xu, prep["gn1_w"], prep["gn1_b"], prep["w1"], prep["b1"],
      prep["gn2_w"], prep["gn2_b"], scale, shift,
      prep["w2"], prep["b2"], prep["wout"], prep["bout"])


def unpatch_rearrange(x, patch_size):
    # 'b (c p) l -> b c (l p)'
    B, CP, Lin = x.shape
    C = CP // patch_size
    return (x.reshape(B, C, patch_size, Lin)
             .transpose(0, 1, 3, 2)
             .reshape(B, C, Lin * patch_size))


def prepare_params(params):
    """One-time parameter preprocessing (done outside the jitted forward)."""
    Cout = params["b1"].shape[0]
    Cin = params["gn1_w"].shape[0]
    K = params["w1"].shape[2]
    prep = {
        "gn1_w": params["gn1_w"].reshape(Cin, 1),
        "gn1_b": params["gn1_b"].reshape(Cin, 1),
        # (Cout, Cin, K) -> (Cout, K, Cin) -> (Cout, K*Cin) so slab rows [k*C + c]
        # match weight columns [k*C + c].
        "w1": jnp.transpose(params["w1"], (0, 2, 1)).reshape(Cout, K * Cin),
        "b1": params["b1"].reshape(Cout, 1),
        "gn2_w": params["gn2_w"].reshape(Cout, 1),
        "gn2_b": params["gn2_b"].reshape(Cout, 1),
        "w2": jnp.transpose(params["w2"], (0, 2, 1)).reshape(Cout, K * Cout),
        "b2": params["b2"].reshape(Cout, 1),
        "wout": params["wout"],
        "bout": params["bout"].reshape(Cout, 1),
        "lin_w": params["lin_w"],
        "lin_b": params["lin_b"],
    }
    return jax.tree_util.tree_map(jnp.asarray, prep)


@functools.partial(jax.jit, static_argnames=("patch_size",))
def unpatcher_forward(x, mapping, prep, patch_size):
    xu = unpatch_rearrange(x, patch_size)                # (B, Cin, L)
    B = xu.shape[0]
    Cout = prep["b1"].shape[0]

    # MappingToScaleShift: SiLU -> Linear (tiny gemm, left to XLA; result fed to kernel)
    ms = mapping * jax.nn.sigmoid(mapping)
    ss = ms @ prep["lin_w"].T + prep["lin_b"]            # (B, 2*Cout)
    scale = ss[:, :Cout].reshape(B, Cout, 1)
    shift = ss[:, Cout:].reshape(B, Cout, 1)

    return _call_unpatcher(xu, scale, shift, prep)


# ---------------------------------------------------------------------------
# Pure-JAX reference (for correctness check)
# ---------------------------------------------------------------------------
def _silu(x):
    return x * jax.nn.sigmoid(x)


def _groupnorm1(x, w, b):
    mean = x.mean(axis=(1, 2), keepdims=True)
    var = ((x - mean) ** 2).mean(axis=(1, 2), keepdims=True)
    return (x - mean) / jnp.sqrt(var + EPS) * w[None, :, None] + b[None, :, None]


def _conv1d(x, w, b, padding):
    out = jax.lax.conv_general_dilated(
        x, w, window_strides=(1,), padding=[(padding, padding)],
        dimension_numbers=("NCH", "OIH", "NCH"))
    return out + b[None, :, None]


def unpatcher_reference(x, mapping, params, patch_size):
    xu = unpatch_rearrange(x, patch_size)
    Cout = params["b1"].shape[0]
    h = _conv1d(_silu(_groupnorm1(xu, params["gn1_w"], params["gn1_b"])),
                params["w1"], params["b1"], 1)
    ss = _silu(mapping) @ params["lin_w"].T + params["lin_b"]
    scale, shift = ss[:, :Cout, None], ss[:, Cout:, None]
    g = _groupnorm1(h, params["gn2_w"], params["gn2_b"])
    g = g * (scale + 1.0) + shift
    g = _conv1d(_silu(g), params["w2"], params["b2"], 1)
    res = _conv1d(xu, params["wout"][:, :, None], params["bout"], 0)
    return g + res


# ---------------------------------------------------------------------------
if __name__ == "__main__":
    # Unpatcher(in_channels=16, out_channels=8, patch_size=2, context_mapping_features=8)
    #   -> ResnetBlock1d(in_channels=8, out_channels=8, num_groups=1)
    B, IN_CH, OUT_CH, P, LIN, F = 2, 16, 8, 2, 16, 8
    CIN = IN_CH // P                                     # 8
    L = LIN * P                                          # 32

    key = jax.random.PRNGKey(0)
    ks = jax.random.split(key, 12)

    params = {
        "gn1_w": 1.0 + 0.1 * jax.random.normal(ks[0], (CIN,), jnp.float32),
        "gn1_b": 0.1 * jax.random.normal(ks[1], (CIN,), jnp.float32),
        "w1": 0.1 * jax.random.normal(ks[2], (OUT_CH, CIN, 3), jnp.float32),
        "b1": 0.1 * jax.random.normal(ks[3], (OUT_CH,), jnp.float32),
        "lin_w": 0.1 * jax.random.normal(ks[4], (2 * OUT_CH, F), jnp.float32),
        "lin_b": 0.1 * jax.random.normal(ks[5], (2 * OUT_CH,), jnp.float32),
        "gn2_w": 1.0 + 0.1 * jax.random.normal(ks[6], (OUT_CH,), jnp.float32),
        "gn2_b": 0.1 * jax.random.normal(ks[7], (OUT_CH,), jnp.float32),
        "w2": 0.1 * jax.random.normal(ks[8], (OUT_CH, OUT_CH, 3), jnp.float32),
        "b2": 0.1 * jax.random.normal(ks[9], (OUT_CH,), jnp.float32),
        # to_out 1x1 conv (in_channels != out_channels)
        "wout": 0.1 * jax.random.normal(ks[10], (OUT_CH, CIN), jnp.float32),
        "bout": 0.1 * jax.random.normal(ks[11], (OUT_CH,), jnp.float32),
    }

    prep = prepare_params(params)                        # one-time weight prep

    kx, km = jax.random.split(jax.random.PRNGKey(42))
    x = jax.random.normal(kx, (B, IN_CH, LIN), jnp.float32)
    mapping = jax.random.normal(km, (B, F), jnp.float32)

    out = unpatcher_forward(x, mapping, prep, P)
    out = jax.block_until_ready(out)

    ref = unpatcher_reference(x, mapping, params, P)
    ref = jax.block_until_ready(ref)

    assert out.shape == (B, OUT_CH, L), out.shape
    np.testing.assert_allclose(np.asarray(out), np.asarray(ref), rtol=1e-2, atol=1e-2)

    print("KERNEL_OK")
</pallas_src>

<mosaic_0001>
module attributes {stable_mosaic.version = 11 : i64} {
  func.func @_unpatcher_kernel(%arg0: i32, %arg1: memref<2x8x32xf32, #tpu.memory_space<vmem>>, %arg2: memref<8x1xf32, #tpu.memory_space<vmem>>, %arg3: memref<8x1xf32, #tpu.memory_space<vmem>>, %arg4: memref<8x24xf32, #tpu.memory_space<vmem>>, %arg5: memref<8x1xf32, #tpu.memory_space<vmem>>, %arg6: memref<8x1xf32, #tpu.memory_space<vmem>>, %arg7: memref<8x1xf32, #tpu.memory_space<vmem>>, %arg8: memref<2x8x1xf32, #tpu.memory_space<vmem>>, %arg9: memref<2x8x1xf32, #tpu.memory_space<vmem>>, %arg10: memref<8x24xf32, #tpu.memory_space<vmem>>, %arg11: memref<8x1xf32, #tpu.memory_space<vmem>>, %arg12: memref<8x8xf32, #tpu.memory_space<vmem>>, %arg13: memref<8x1xf32, #tpu.memory_space<vmem>>, %arg14: memref<2x8x32xf32, #tpu.memory_space<vmem>>) attributes {dimension_semantics = [#tpu.dimension_semantics<arbitrary>], iteration_bounds = array<i64: 1>, scalar_prefetch = 0 : i64, scratch_operands = 0 : i64, tpu.core_type = #tpu.core_type<tc>, window_params = [{pipeline_mode = #tpu.pipeline_mode<synchronous>, transform_indices = @transform_0, window_bounds = array<i64: 2, 8, 32>}, {pipeline_mode = #tpu.pipeline_mode<synchronous>, transform_indices = @transform_1, window_bounds = array<i64: 8, 1>}, {pipeline_mode = #tpu.pipeline_mode<synchronous>, transform_indices = @transform_2, window_bounds = array<i64: 8, 1>}, {pipeline_mode = #tpu.pipeline_mode<synchronous>, transform_indices = @transform_3, window_bounds = array<i64: 8, 24>}, {pipeline_mode = #tpu.pipeline_mode<synchronous>, transform_indices = @transform_4, window_bounds = array<i64: 8, 1>}, {pipeline_mode = #tpu.pipeline_mode<synchronous>, transform_indices = @transform_5, window_bounds = array<i64: 8, 1>}, {pipeline_mode = #tpu.pipeline_mode<synchronous>, transform_indices = @transform_6, window_bounds = array<i64: 8, 1>}, {pipeline_mode = #tpu.pipeline_mode<synchronous>, transform_indices = @transform_7, window_bounds = array<i64: 2, 8, 1>}, {pipeline_mode = #tpu.pipeline_mode<synchronous>, transform_indices = @transform_8, window_bounds = array<i64: 2, 8, 1>}, {pipeline_mode = #tpu.pipeline_mode<synchronous>, transform_indices = @transform_9, window_bounds = array<i64: 8, 24>}, {pipeline_mode = #tpu.pipeline_mode<synchronous>, transform_indices = @transform_10, window_bounds = array<i64: 8, 1>}, {pipeline_mode = #tpu.pipeline_mode<synchronous>, transform_indices = @transform_11, window_bounds = array<i64: 8, 8>}, {pipeline_mode = #tpu.pipeline_mode<synchronous>, transform_indices = @transform_12, window_bounds = array<i64: 8, 1>}, {pipeline_mode = #tpu.pipeline_mode<synchronous>, transform_indices = @transform_13, window_bounds = array<i64: 2, 8, 32>}]} {
    %c0 = arith.constant 0 : index
    %c0_0 = arith.constant 0 : index
    %0 = vector.load %arg2[%c0, %c0_0] : memref<8x1xf32, #tpu.memory_space<vmem>>, vector<8x1xf32>
    %c0_1 = arith.constant 0 : index
    %c0_2 = arith.constant 0 : index
    %1 = vector.load %arg3[%c0_1, %c0_2] : memref<8x1xf32, #tpu.memory_space<vmem>>, vector<8x1xf32>
    %c0_3 = arith.constant 0 : index
    %c0_4 = arith.constant 0 : index
    %2 = vector.load %arg6[%c0_3, %c0_4] : memref<8x1xf32, #tpu.memory_space<vmem>>, vector<8x1xf32>
    %c0_5 = arith.constant 0 : index
    %c0_6 = arith.constant 0 : index
    %3 = vector.load %arg7[%c0_5, %c0_6] : memref<8x1xf32, #tpu.memory_space<vmem>>, vector<8x1xf32>
    %c0_7 = arith.constant 0 : index
    %c0_8 = arith.constant 0 : index
    %4 = vector.load %arg4[%c0_7, %c0_8] : memref<8x24xf32, #tpu.memory_space<vmem>>, vector<8x24xf32>
    %c0_9 = arith.constant 0 : index
    %c0_10 = arith.constant 0 : index
    %5 = vector.load %arg5[%c0_9, %c0_10] : memref<8x1xf32, #tpu.memory_space<vmem>>, vector<8x1xf32>
    %c0_11 = arith.constant 0 : index
    %c0_12 = arith.constant 0 : index
    %6 = vector.load %arg10[%c0_11, %c0_12] : memref<8x24xf32, #tpu.memory_space<vmem>>, vector<8x24xf32>
    %c0_13 = arith.constant 0 : index
    %c0_14 = arith.constant 0 : index
    %7 = vector.load %arg11[%c0_13, %c0_14] : memref<8x1xf32, #tpu.memory_space<vmem>>, vector<8x1xf32>
    %c0_15 = arith.constant 0 : index
    %c0_16 = arith.constant 0 : index
    %8 = vector.load %arg12[%c0_15, %c0_16] : memref<8x8xf32, #tpu.memory_space<vmem>>, vector<8x8xf32>
    %c0_17 = arith.constant 0 : index
    %c0_18 = arith.constant 0 : index
    %9 = vector.load %arg13[%c0_17, %c0_18] : memref<8x1xf32, #tpu.memory_space<vmem>>, vector<8x1xf32>
    %c0_19 = arith.constant 0 : index
    %c0_20 = arith.constant 0 : index
    %c0_21 = arith.constant 0 : index
    %10 = vector.load %arg1[%c0_19, %c0_20, %c0_21] : memref<2x8x32xf32, #tpu.memory_space<vmem>>, vector<1x8x32xf32>
    %11 = vector.shape_cast %10 : vector<1x8x32xf32> to vector<8x32xf32>
    %12 = vector.shape_cast %11 : vector<8x32xf32> to vector<1x8x32xf32>
    %cst = arith.constant dense<0.000000e+00> : vector<1xf32>
    %13 = vector.multi_reduction <add>, %12, %cst [1, 2] : vector<1x8x32xf32> to vector<1xf32>
    %14 = vector.shape_cast %13 : vector<1xf32> to vector<1x1x1xf32>
    %15 = vector.extract %14[0, 0, 0] : f32 from vector<1x1x1xf32>
    %16 = arith.mulf %11, %11 : vector<8x32xf32>
    %17 = vector.shape_cast %16 : vector<8x32xf32> to vector<1x8x32xf32>
    %cst_22 = arith.constant dense<0.000000e+00> : vector<1xf32>
    %18 = vector.multi_reduction <add>, %17, %cst_22 [1, 2] : vector<1x8x32xf32> to vector<1xf32>
    %19 = vector.shape_cast %18 : vector<1xf32> to vector<1x1x1xf32>
    %20 = vector.extract %19[0, 0, 0] : f32 from vector<1x1x1xf32>
    %cst_23 = arith.constant 3.906250e-03 : f32
    %21 = arith.mulf %15, %cst_23 : f32
    %cst_24 = arith.constant 3.906250e-03 : f32
    %22 = arith.mulf %20, %cst_24 : f32
    %23 = arith.mulf %21, %21 : f32
    %24 = arith.subf %22, %23 : f32
    %25 = vector.broadcast %21 : f32 to vector<8x32xf32>
    %26 = arith.subf %11, %25 : vector<8x32xf32>
    %cst_25 = arith.constant 9.99999974E-6 : f32
    %27 = arith.addf %24, %cst_25 : f32
    %28 = math.rsqrt %27 : f32
    %29 = vector.broadcast %28 : f32 to vector<8x32xf32>
    %30 = arith.mulf %26, %29 : vector<8x32xf32>
    %31 = vector.broadcast %0 : vector<8x1xf32> to vector<8x32xf32>
    %32 = arith.mulf %30, %31 : vector<8x32xf32>
    %33 = vector.broadcast %1 : vector<8x1xf32> to vector<8x32xf32>
    %34 = arith.addf %32, %33 : vector<8x32xf32>
    %35 = arith.negf %34 : vector<8x32xf32>
    %36 = math.exp %35 : vector<8x32xf32>
    %cst_26 = arith.constant 1.000000e+00 : f32
    %37 = vector.broadcast %cst_26 : f32 to vector<8x32xf32>
    %38 = arith.addf %37, %36 : vector<8x32xf32>
    %39 = arith.divf %37, %38 : vector<8x32xf32>
    %40 = arith.mulf %34, %39 : vector<8x32xf32>
    %cst_27 = arith.constant 0.000000e+00 : f32
    %41 = vector.broadcast %cst_27 : f32 to vector<8x1xf32>
    %42 = vector.extract_strided_slice %40 {offsets = [0, 0], sizes = [8, 31], strides = [1, 1]} : vector<8x32xf32> to vector<8x31xf32>
    %43 = tpu.concatenate %41, %42 in 1 : vector<8x1xf32>, vector<8x31xf32> -> vector<8x32xf32>
    %44 = vector.extract_strided_slice %40 {offsets = [0, 1], sizes = [8, 31], strides = [1, 1]} : vector<8x32xf32> to vector<8x31xf32>
    %45 = tpu.concatenate %44, %41 in 1 : vector<8x31xf32>, vector<8x1xf32> -> vector<8x32xf32>
    %46 = tpu.concatenate %43, %40, %45 in 0 : vector<8x32xf32>, vector<8x32xf32>, vector<8x32xf32> -> vector<24x32xf32>
    %cst_28 = arith.constant dense<0.000000e+00> : vector<8x32xf32>
    %47 = tpu.matmul %4, %46, %cst_28 {dimension_numbers = #tpu.dot_dimension_numbers<[1], [0], [0], [1], [0, 0, 1, 1], [], []>} : vector<8x24xf32>, vector<24x32xf32>, vector<8x32xf32> -> vector<8x32xf32>
    %48 = vector.broadcast %5 : vector<8x1xf32> to vector<8x32xf32>
    %49 = arith.addf %47, %48 : vector<8x32xf32>
    %50 = vector.shape_cast %49 : vector<8x32xf32> to vector<1x8x32xf32>
    %cst_29 = arith.constant dense<0.000000e+00> : vector<1xf32>
    %51 = vector.multi_reduction <add>, %50, %cst_29 [1, 2] : vector<1x8x32xf32> to vector<1xf32>
    %52 = vector.shape_cast %51 : vector<1xf32> to vector<1x1x1xf32>
    %53 = vector.extract %52[0, 0, 0] : f32 from vector<1x1x1xf32>
    %54 = arith.mulf %49, %49 : vector<8x32xf32>
    %55 = vector.shape_cast %54 : vector<8x32xf32> to vector<1x8x32xf32>
    %cst_30 = arith.constant dense<0.000000e+00> : vector<1xf32>
    %56 = vector.multi_reduction <add>, %55, %cst_30 [1, 2] : vector<1x8x32xf32> to vector<1xf32>
    %57 = vector.shape_cast %56 : vector<1xf32> to vector<1x1x1xf32>
    %58 = vector.extract %57[0, 0, 0] : f32 from vector<1x1x1xf32>
    %cst_31 = arith.constant 3.906250e-03 : f32
    %59 = arith.mulf %53, %cst_31 : f32
    %cst_32 = arith.constant 3.906250e-03 : f32
    %60 = arith.mulf %58, %cst_32 : f32
    %61 = arith.mulf %59, %59 : f32
    %62 = arith.subf %60, %61 : f32
    %63 = vector.broadcast %59 : f32 to vector<8x32xf32>
    %64 = arith.subf %49, %63 : vector<8x32xf32>
    %cst_33 = arith.constant 9.99999974E-6 : f32
    %65 = arith.addf %62, %cst_33 : f32
    %66 = math.rsqrt %65 : f32
    %67 = vector.broadcast %66 : f32 to vector<8x32xf32>
    %68 = arith.mulf %64, %67 : vector<8x32xf32>
    %69 = vector.broadcast %2 : vector<8x1xf32> to vector<8x32xf32>
    %70 = arith.mulf %68, %69 : vector<8x32xf32>
    %71 = vector.broadcast %3 : vector<8x1xf32> to vector<8x32xf32>
    %72 = arith.addf %70, %71 : vector<8x32xf32>
    %c0_34 = arith.constant 0 : index
    %c0_35 = arith.constant 0 : index
    %c0_36 = arith.constant 0 : index
    %73 = vector.load %arg8[%c0_34, %c0_35, %c0_36] : memref<2x8x1xf32, #tpu.memory_space<vmem>>, vector<1x8x1xf32>
    %74 = vector.shape_cast %73 : vector<1x8x1xf32> to vector<8x1xf32>
    %cst_37 = arith.constant 1.000000e+00 : f32
    %75 = vector.broadcast %cst_37 : f32 to vector<8x1xf32>
    %76 = arith.addf %74, %75 : vector<8x1xf32>
    %77 = vector.broadcast %76 : vector<8x1xf32> to vector<8x32xf32>
    %78 = arith.mulf %72, %77 : vector<8x32xf32>
    %c0_38 = arith.constant 0 : index
    %c0_39 = arith.constant 0 : index
    %c0_40 = arith.constant 0 : index
    %79 = vector.load %arg9[%c0_38, %c0_39, %c0_40] : memref<2x8x1xf32, #tpu.memory_space<vmem>>, vector<1x8x1xf32>
    %80 = vector.shape_cast %79 : vector<1x8x1xf32> to vector<8x1xf32>
    %81 = vector.broadcast %80 : vector<8x1xf32> to vector<8x32xf32>
    %82 = arith.addf %78, %81 : vector<8x32xf32>
    %83 = arith.negf %82 : vector<8x32xf32>
    %84 = math.exp %83 : vector<8x32xf32>
    %cst_41 = arith.constant 1.000000e+00 : f32
    %85 = vector.broadcast %cst_41 : f32 to vector<8x32xf32>
    %86 = arith.addf %85, %84 : vector<8x32xf32>
    %87 = arith.divf %85, %86 : vector<8x32xf32>
    %88 = arith.mulf %82, %87 : vector<8x32xf32>
    %cst_42 = arith.constant 0.000000e+00 : f32
    %89 = vector.broadcast %cst_42 : f32 to vector<8x1xf32>
    %90 = vector.extract_strided_slice %88 {offsets = [0, 0], sizes = [8, 31], strides = [1, 1]} : vector<8x32xf32> to vector<8x31xf32>
    %91 = tpu.concatenate %89, %90 in 1 : vector<8x1xf32>, vector<8x31xf32> -> vector<8x32xf32>
    %92 = vector.extract_strided_slice %88 {offsets = [0, 1], sizes = [8, 31], strides = [1, 1]} : vector<8x32xf32> to vector<8x31xf32>
    %93 = tpu.concatenate %92, %89 in 1 : vector<8x31xf32>, vector<8x1xf32> -> vector<8x32xf32>
    %94 = tpu.concatenate %91, %88, %93 in 0 : vector<8x32xf32>, vector<8x32xf32>, vector<8x32xf32> -> vector<24x32xf32>
    %cst_43 = arith.constant dense<0.000000e+00> : vector<8x32xf32>
    %95 = tpu.matmul %6, %94, %cst_43 {dimension_numbers = #tpu.dot_dimension_numbers<[1], [0], [0], [1], [0, 0, 1, 1], [], []>} : vector<8x24xf32>, vector<24x32xf32>, vector<8x32xf32> -> vector<8x32xf32>
    %96 = vector.broadcast %7 : vector<8x1xf32> to vector<8x32xf32>
    %97 = arith.addf %95, %96 : vector<8x32xf32>
    %cst_44 = arith.constant dense<0.000000e+00> : vector<8x32xf32>
    %98 = tpu.matmul %8, %11, %cst_44 {dimension_numbers = #tpu.dot_dimension_numbers<[1], [0], [0], [1], [0, 0, 1, 1], [], []>} : vector<8x8xf32>, vector<8x32xf32>, vector<8x32xf32> -> vector<8x32xf32>
    %99 = vector.broadcast %9 : vector<8x1xf32> to vector<8x32xf32>
    %100 = arith.addf %98, %99 : vector<8x32xf32>
    %101 = arith.addf %97, %100 : vector<8x32xf32>
    %c0_45 = arith.constant 0 : index
    %c0_46 = arith.constant 0 : index
    %c0_47 = arith.constant 0 : index
    %102 = vector.load %arg14[%c0_45, %c0_46, %c0_47] : memref<2x8x32xf32, #tpu.memory_space<vmem>>, vector<1x8x32xf32>
    %103 = vector.shape_cast %102 : vector<1x8x32xf32> to vector<8x32xf32>
    %104 = vector.shape_cast %101 : vector<8x32xf32> to vector<1x8x32xf32>
    tpu.vector_store %arg14[%c0_45, %c0_46, %c0_47], %104 {strides = array<i32>} : memref<2x8x32xf32, #tpu.memory_space<vmem>>, vector<1x8x32xf32>,
    %c1 = arith.constant 1 : index
    %c0_48 = arith.constant 0 : index
    %c0_49 = arith.constant 0 : index
    %105 = vector.load %arg1[%c1, %c0_48, %c0_49] : memref<2x8x32xf32, #tpu.memory_space<vmem>>, vector<1x8x32xf32>
    %106 = vector.shape_cast %105 : vector<1x8x32xf32> to vector<8x32xf32>
    %107 = vector.shape_cast %106 : vector<8x32xf32> to vector<1x8x32xf32>
    %cst_50 = arith.constant dense<0.000000e+00> : vector<1xf32>
    %108 = vector.multi_reduction <add>, %107, %cst_50 [1, 2] : vector<1x8x32xf32> to vector<1xf32>
    %109 = vector.shape_cast %108 : vector<1xf32> to vector<1x1x1xf32>
    %110 = vector.extract %109[0, 0, 0] : f32 from vector<1x1x1xf32>
    %111 = arith.mulf %106, %106 : vector<8x32xf32>
    %112 = vector.shape_cast %111 : vector<8x32xf32> to vector<1x8x32xf32>
    %cst_51 = arith.constant dense<0.000000e+00> : vector<1xf32>
    %113 = vector.multi_reduction <add>, %112, %cst_51 [1, 2] : vector<1x8x32xf32> to vector<1xf32>
    %114 = vector.shape_cast %113 : vector<1xf32> to vector<1x1x1xf32>
    %115 = vector.extract %114[0, 0, 0] : f32 from vector<1x1x1xf32>
    %cst_52 = arith.constant 3.906250e-03 : f32
    %116 = arith.mulf %110, %cst_52 : f32
    %cst_53 = arith.constant 3.906250e-03 : f32
    %117 = arith.mulf %115, %cst_53 : f32
    %118 = arith.mulf %116, %116 : f32
    %119 = arith.subf %117, %118 : f32
    %120 = vector.broadcast %116 : f32 to vector<8x32xf32>
    %121 = arith.subf %106, %120 : vector<8x32xf32>
    %cst_54 = arith.constant 9.99999974E-6 : f32
    %122 = arith.addf %119, %cst_54 : f32
    %123 = math.rsqrt %122 : f32
    %124 = vector.broadcast %123 : f32 to vector<8x32xf32>
    %125 = arith.mulf %121, %124 : vector<8x32xf32>
    %126 = vector.broadcast %0 : vector<8x1xf32> to vector<8x32xf32>
    %127 = arith.mulf %125, %126 : vector<8x32xf32>
    %128 = vector.broadcast %1 : vector<8x1xf32> to vector<8x32xf32>
    %129 = arith.addf %127, %128 : vector<8x32xf32>
    %130 = arith.negf %129 : vector<8x32xf32>
    %131 = math.exp %130 : vector<8x32xf32>
    %cst_55 = arith.constant 1.000000e+00 : f32
    %132 = vector.broadcast %cst_55 : f32 to vector<8x32xf32>
    %133 = arith.addf %132, %131 : vector<8x32xf32>
    %134 = arith.divf %132, %133 : vector<8x32xf32>
    %135 = arith.mulf %129, %134 : vector<8x32xf32>
    %cst_56 = arith.constant 0.000000e+00 : f32
    %136 = vector.broadcast %cst_56 : f32 to vector<8x1xf32>
    %137 = vector.extract_strided_slice %135 {offsets = [0, 0], sizes = [8, 31], strides = [1, 1]} : vector<8x32xf32> to vector<8x31xf32>
    %138 = tpu.concatenate %136, %137 in 1 : vector<8x1xf32>, vector<8x31xf32> -> vector<8x32xf32>
    %139 = vector.extract_strided_slice %135 {offsets = [0, 1], sizes = [8, 31], strides = [1, 1]} : vector<8x32xf32> to vector<8x31xf32>
    %140 = tpu.concatenate %139, %136 in 1 : vector<8x31xf32>, vector<8x1xf32> -> vector<8x32xf32>
    %141 = tpu.concatenate %138, %135, %140 in 0 : vector<8x32xf32>, vector<8x32xf32>, vector<8x32xf32> -> vector<24x32xf32>
    %cst_57 = arith.constant dense<0.000000e+00> : vector<8x32xf32>
    %142 = tpu.matmul %4, %141, %cst_57 {dimension_numbers = #tpu.dot_dimension_numbers<[1], [0], [0], [1], [0, 0, 1, 1], [], []>} : vector<8x24xf32>, vector<24x32xf32>, vector<8x32xf32> -> vector<8x32xf32>
    %143 = vector.broadcast %5 : vector<8x1xf32> to vector<8x32xf32>
    %144 = arith.addf %142, %143 : vector<8x32xf32>
    %145 = vector.shape_cast %144 : vector<8x32xf32> to vector<1x8x32xf32>
    %cst_58 = arith.constant dense<0.000000e+00> : vector<1xf32>
    %146 = vector.multi_reduction <add>, %145, %cst_58 [1, 2] : vector<1x8x32xf32> to vector<1xf32>
    %147 = vector.shape_cast %146 : vector<1xf32> to vector<1x1x1xf32>
    %148 = vector.extract %147[0, 0, 0] : f32 from vector<1x1x1xf32>
    %149 = arith.mulf %144, %144 : vector<8x32xf32>
    %150 = vector.shape_cast %149 : vector<8x32xf32> to vector<1x8x32xf32>
    %cst_59 = arith.constant dense<0.000000e+00> : vector<1xf32>
    %151 = vector.multi_reduction <add>, %150, %cst_59 [1, 2] : vector<1x8x32xf32> to vector<1xf32>
    %152 = vector.shape_cast %151 : vector<1xf32> to vector<1x1x1xf32>
    %153 = vector.extract %152[0, 0, 0] : f32 from vector<1x1x1xf32>
    %cst_60 = arith.constant 3.906250e-03 : f32
    %154 = arith.mulf %148, %cst_60 : f32
    %cst_61 = arith.constant 3.906250e-03 : f32
    %155 = arith.mulf %153, %cst_61 : f32
    %156 = arith.mulf %154, %154 : f32
    %157 = arith.subf %155, %156 : f32
    %158 = vector.broadcast %154 : f32 to vector<8x32xf32>
    %159 = arith.subf %144, %158 : vector<8x32xf32>
    %cst_62 = arith.constant 9.99999974E-6 : f32
    %160 = arith.addf %157, %cst_62 : f32
    %161 = math.rsqrt %160 : f32
    %162 = vector.broadcast %161 : f32 to vector<8x32xf32>
    %163 = arith.mulf %159, %162 : vector<8x32xf32>
    %164 = vector.broadcast %2 : vector<8x1xf32> to vector<8x32xf32>
    %165 = arith.mulf %163, %164 : vector<8x32xf32>
    %166 = vector.broadcast %3 : vector<8x1xf32> to vector<8x32xf32>
    %167 = arith.addf %165, %166 : vector<8x32xf32>
    %c1_63 = arith.constant 1 : index
    %c0_64 = arith.constant 0 : index
    %c0_65 = arith.constant 0 : index
    %168 = vector.load %arg8[%c1_63, %c0_64, %c0_65] : memref<2x8x1xf32, #tpu.memory_space<vmem>>, vector<1x8x1xf32>
    %169 = vector.shape_cast %168 : vector<1x8x1xf32> to vector<8x1xf32>
    %cst_66 = arith.constant 1.000000e+00 : f32
    %170 = vector.broadcast %cst_66 : f32 to vector<8x1xf32>
    %171 = arith.addf %169, %170 : vector<8x1xf32>
    %172 = vector.broadcast %171 : vector<8x1xf32> to vector<8x32xf32>
    %173 = arith.mulf %167, %172 : vector<8x32xf32>
    %c1_67 = arith.constant 1 : index
    %c0_68 = arith.constant 0 : index
    %c0_69 = arith.constant 0 : index
    %174 = vector.load %arg9[%c1_67, %c0_68, %c0_69] : memref<2x8x1xf32, #tpu.memory_space<vmem>>, vector<1x8x1xf32>
    %175 = vector.shape_cast %174 : vector<1x8x1xf32> to vector<8x1xf32>
    %176 = vector.broadcast %175 : vector<8x1xf32> to vector<8x32xf32>
    %177 = arith.addf %173, %176 : vector<8x32xf32>
    %178 = arith.negf %177 : vector<8x32xf32>
    %179 = math.exp %178 : vector<8x32xf32>
    %cst_70 = arith.constant 1.000000e+00 : f32
    %180 = vector.broadcast %cst_70 : f32 to vector<8x32xf32>
    %181 = arith.addf %180, %179 : vector<8x32xf32>
    %182 = arith.divf %180, %181 : vector<8x32xf32>
    %183 = arith.mulf %177, %182 : vector<8x32xf32>
    %cst_71 = arith.constant 0.000000e+00 : f32
    %184 = vector.broadcast %cst_71 : f32 to vector<8x1xf32>
    %185 = vector.extract_strided_slice %183 {offsets = [0, 0], sizes = [8, 31], strides = [1, 1]} : vector<8x32xf32> to vector<8x31xf32>
    %186 = tpu.concatenate %184, %185 in 1 : vector<8x1xf32>, vector<8x31xf32> -> vector<8x32xf32>
    %187 = vector.extract_strided_slice %183 {offsets = [0, 1], sizes = [8, 31], strides = [1, 1]} : vector<8x32xf32> to vector<8x31xf32>
    %188 = tpu.concatenate %187, %184 in 1 : vector<8x31xf32>, vector<8x1xf32> -> vector<8x32xf32>
    %189 = tpu.concatenate %186, %183, %188 in 0 : vector<8x32xf32>, vector<8x32xf32>, vector<8x32xf32> -> vector<24x32xf32>
    %cst_72 = arith.constant dense<0.000000e+00> : vector<8x32xf32>
    %190 = tpu.matmul %6, %189, %cst_72 {dimension_numbers = #tpu.dot_dimension_numbers<[1], [0], [0], [1], [0, 0, 1, 1], [], []>} : vector<8x24xf32>, vector<24x32xf32>, vector<8x32xf32> -> vector<8x32xf32>
    %191 = vector.broadcast %7 : vector<8x1xf32> to vector<8x32xf32>
    %192 = arith.addf %190, %191 : vector<8x32xf32>
    %cst_73 = arith.constant dense<0.000000e+00> : vector<8x32xf32>
    %193 = tpu.matmul %8, %106, %cst_73 {dimension_numbers = #tpu.dot_dimension_numbers<[1], [0], [0], [1], [0, 0, 1, 1], [], []>} : vector<8x8xf32>, vector<8x32xf32>, vector<8x32xf32> -> vector<8x32xf32>
    %194 = vector.broadcast %9 : vector<8x1xf32> to vector<8x32xf32>
    %195 = arith.addf %193, %194 : vector<8x32xf32>
    %196 = arith.addf %192, %195 : vector<8x32xf32>
    %c1_74 = arith.constant 1 : index
    %c0_75 = arith.constant 0 : index
    %c0_76 = arith.constant 0 : index
    %197 = vector.load %arg14[%c1_74, %c0_75, %c0_76] : memref<2x8x32xf32, #tpu.memory_space<vmem>>, vector<1x8x32xf32>
    %198 = vector.shape_cast %197 : vector<1x8x32xf32> to vector<8x32xf32>
    %199 = vector.shape_cast %196 : vector<8x32xf32> to vector<1x8x32xf32>
    tpu.vector_store %arg14[%c1_74, %c0_75, %c0_76], %199 {strides = array<i32>} : memref<2x8x32xf32, #tpu.memory_space<vmem>>, vector<1x8x32xf32>,
    return
  }
  func.func @transform_0(%arg0: i32) -> (i32, i32, i32) {
    %c0_i32 = arith.constant 0 : i32
    %c0_i32_0 = arith.constant 0 : i32
    %c0_i32_1 = arith.constant 0 : i32
    %c0_i32_2 = arith.constant 0 : i32
    return %c0_i32, %c0_i32_0, %c0_i32_1 : i32, i32, i32
  }
  func.func @transform_1(%arg0: i32) -> (i32, i32) {
    %c0_i32 = arith.constant 0 : i32
    %c0_i32_0 = arith.constant 0 : i32
    %c0_i32_1 = arith.constant 0 : i32
    return %c0_i32, %c0_i32_0 : i32, i32
  }
  func.func @transform_2(%arg0: i32) -> (i32, i32) {
    %c0_i32 = arith.constant 0 : i32
    %c0_i32_0 = arith.constant 0 : i32
    %c0_i32_1 = arith.constant 0 : i32
    return %c0_i32, %c0_i32_0 : i32, i32
  }
  func.func @transform_3(%arg0: i32) -> (i32, i32) {
    %c0_i32 = arith.constant 0 : i32
    %c0_i32_0 = arith.constant 0 : i32
    %c0_i32_1 = arith.constant 0 : i32
    return %c0_i32, %c0_i32_0 : i32, i32
  }
  func.func @transform_4(%arg0: i32) -> (i32, i32) {
    %c0_i32 = arith.constant 0 : i32
    %c0_i32_0 = arith.constant 0 : i32
    %c0_i32_1 = arith.constant 0 : i32
    return %c0_i32, %c0_i32_0 : i32, i32
  }
  func.func @transform_5(%arg0: i32) -> (i32, i32) {
    %c0_i32 = arith.constant 0 : i32
    %c0_i32_0 = arith.constant 0 : i32
    %c0_i32_1 = arith.constant 0 : i32
    return %c0_i32, %c0_i32_0 : i32, i32
  }
  func.func @transform_6(%arg0: i32) -> (i32, i32) {
    %c0_i32 = arith.constant 0 : i32
    %c0_i32_0 = arith.constant 0 : i32
    %c0_i32_1 = arith.constant 0 : i32
    return %c0_i32, %c0_i32_0 : i32, i32
  }
  func.func @transform_7(%arg0: i32) -> (i32, i32, i32) {
    %c0_i32 = arith.constant 0 : i32
    %c0_i32_0 = arith.constant 0 : i32
    %c0_i32_1 = arith.constant 0 : i32
    %c0_i32_2 = arith.constant 0 : i32
    return %c0_i32, %c0_i32_0, %c0_i32_1 : i32, i32, i32
  }
  func.func @transform_8(%arg0: i32) -> (i32, i32, i32) {
    %c0_i32 = arith.constant 0 : i32
    %c0_i32_0 = arith.constant 0 : i32
    %c0_i32_1 = arith.constant 0 : i32
    %c0_i32_2 = arith.constant 0 : i32
    return %c0_i32, %c0_i32_0, %c0_i32_1 : i32, i32, i32
  }
  func.func @transform_9(%arg0: i32) -> (i32, i32) {
    %c0_i32 = arith.constant 0 : i32
    %c0_i32_0 = arith.constant 0 : i32
    %c0_i32_1 = arith.constant 0 : i32
    return %c0_i32, %c0_i32_0 : i32, i32
  }
  func.func @transform_10(%arg0: i32) -> (i32, i32) {
    %c0_i32 = arith.constant 0 : i32
    %c0_i32_0 = arith.constant 0 : i32
    %c0_i32_1 = arith.constant 0 : i32
    return %c0_i32, %c0_i32_0 : i32, i32
  }
  func.func @transform_11(%arg0: i32) -> (i32, i32) {
    %c0_i32 = arith.constant 0 : i32
    %c0_i32_0 = arith.constant 0 : i32
    %c0_i32_1 = arith.constant 0 : i32
    return %c0_i32, %c0_i32_0 : i32, i32
  }
  func.func @transform_12(%arg0: i32) -> (i32, i32) {
    %c0_i32 = arith.constant 0 : i32
    %c0_i32_0 = arith.constant 0 : i32
    %c0_i32_1 = arith.constant 0 : i32
    return %c0_i32, %c0_i32_0 : i32, i32
  }
  func.func @transform_13(%arg0: i32) -> (i32, i32, i32) {
    %c0_i32 = arith.constant 0 : i32
    %c0_i32_0 = arith.constant 0 : i32
    %c0_i32_1 = arith.constant 0 : i32
    %c0_i32_2 = arith.constant 0 : i32
    return %c0_i32, %c0_i32_0, %c0_i32_1 : i32, i32, i32
  }
}

</mosaic_0001>

<bundles_post_ra>
// kernel: unpatcher_forward.1
= control target key start
LH: loop header
LB: loop body
LE: loop exit
PB: predicated region body
PF: predicated region fallthrough
CT: control target
= control target key end

     0   :  { %vm56_vm0 = vcmask 261120   ;;  %s1230_s0 = inlined_call_operand.vmem [shape: f32[2,8,32], index: 0, kind: input, shape index: {}]   ;;  %s1231_s1 = inlined_call_operand.vmem [shape: f32[8,1], index: 1, kind: input, shape index: {}]   ;;  %s1232_s2 = inlined_call_operand.vmem [shape: f32[8,1], index: 2, kind: input, shape index: {}]   ;;  %s1233_s3 = inlined_call_operand.vmem [shape: f32[8,24], index: 3, kind: input, shape index: {}]   ;;  %s1234_s4 = inlined_call_operand.vmem [shape: f32[8,1], index: 4, kind: input, shape index: {}]   ;;  %s1235_s5 = inlined_call_operand.vmem [shape: f32[8,1], index: 5, kind: input, shape index: {}]   ;;  %s1236_s6 = inlined_call_operand.vmem [shape: f32[8,1], index: 6, kind: input, shape index: {}]   ;;  %s1237_s7 = inlined_call_operand.vmem [shape: f32[2,8,1], index: 7, kind: input, shape index: {}]   ;;  %s1238_s8 = inlined_call_operand.vmem [shape: f32[2,8,1], index: 8, kind: input, shape index: {}]   ;;  %s1239_s9 = inlined_call_operand.vmem [shape: f32[8,24], index: 9, kind: input, shape index: {}]   ;;  %s1240_s10 = inlined_call_operand.vmem [shape: f32[8,1], index: 10, kind: input, shape index: {}]   ;;  %s1241_s11 = inlined_call_operand.vmem [shape: f32[8,8], index: 11, kind: input, shape index: {}]   ;;  %s1242_s12 = inlined_call_operand.vmem [shape: f32[8,1], index: 12, kind: input, shape index: {}]   ;;  %s1243_s13 = inlined_call_operand.hbm [shape: f32[2,8,32], index: 13, kind: output, shape index: {}]  }
   0x1   :  { %v1065_v0 = vld [vmem:[%s1230_s0] sm:$0xff] }
   0x2   :  { %18 = vsyncpa [#allocation3], 0  ;;  %v57_v1 = vsel %vm56_vm0, %v1065_v0, 0.0  ;;  %v67_v2 = vmul.f32 %v1065_v0, %v1065_v0  ;;  %v982_v4 = vmov 0   ;;  %v45_v5 = vld [vmem:[%s1231_s1] sm:$0xff]  ;;  %v983_v34 = vmov 0.0|0.0  }
   0x3   :  { %58 = vadd.xlane.f32.xlu0 %v57_v1  ;;  %932 = vset.pattern.permute.xlu1 %v982_v4  ;;  %v46_v6 = vld [vmem:[%s1232_s2] sm:$0xff]  ;;  %vm984_vm1 = vmmov 0   ;;  %v985_v35 = vmov 0.0   ;;  %s986_s20 = smov 127   ;;  %s987_s21 = smov 1   ;;  %vm113_vm2 = vcmask 7168  }
   0x4   :  { %v68_v3 = vsel %vm56_vm0, %v67_v2, 0.0  ;;  %933 = vset.pattern.permute.xlu0 %v982_v4  ;;  %92 = vperm.xlu1 %932, %v45_v5   ;;  %v50_v38 = vld [vmem:[%s1234_s4] sm:$0xff]  ;;  %vm785_vm3 = vmneg %vm113_vm2  ;;  %vm988_vm4 = vmmov 1   ;;  %vm118_vm6 = vcmask 252928   ;;  %vm125_vm7 = vcmask 195584   ;;  %v1122_v48 = vld [vmem:[%s1230_s0 + $0x8] sm:$0xff] }
   0x5   :  { %875 = vmatprep.subr.bf16.mxu0 %v983_v34  ;;  %879 = vmatprep.subr.bf16.mxu1 %v983_v34  ;;  %vm1096_vm5 = vmpackc.low %vm988_vm4, %vm785_vm3  ;;  %v1106_v42 = vld [vmem:[%s1233_s3] sm:$0xff]  ;;  %v436_v52 = vsel %vm56_vm0, %v1122_v48, 0.0  ;;  %v446_v53 = vmul.f32 %v1122_v48, %v1122_v48  ;;  %vm358_vm8 = vcmask 64512  }
   0x6   :  { %835 = vmatprep.mubr.msk.f32.mxu0 %vm984_vm1, %v985_v35  ;;  %844 = vmatprep.mubr.msk.f32.mxu1 %vm984_vm1, %v985_v35 }
   0x7   :  { %69 = vadd.xlane.f32.xlu0 %v68_v3  ;;  %v447_v54 = vsel %vm56_vm0, %v446_v53, 0.0 }
   0x8   :  { %98 = vperm.xlu1 %932, %v46_v6  }
  0x83   :  { %v1078_v24 = vpop.permute.xlu1 %92 }
  0x87   :  { %v1082_v29 = vpop.permute.xlu1 %98 }
  0x90   :  { %v59_v7 = vpop.xlane.xlu0 %58 }
  0x91   :  { %v60_v8 = vrot.slane %v59_v7, 4 }
  0x93   :  { %v61_v9 = vadd.f32 %v60_v8, %v59_v7 }
  0x94   :  { %v70_v10 = vpop.xlane.xlu0 %69 }
  0x95   :  { %v62_v11 = vrot.slane %v61_v9, 2  ;;  %v71_v12 = vrot.slane %v70_v10, 4 }
  0x97   :  { %v72_v13 = vadd.f32 %v71_v12, %v70_v10  ;;  %v63_v14 = vadd.f32 %v62_v11, %v61_v9 }
  0x99   :  { %v73_v15 = vrot.slane %v72_v13, 2  ;;  %v64_v16 = vrot.slane %v63_v14, 1 }
  0x9b   :  { %v65_v17 = vadd.f32 %v64_v16, %v63_v14  ;;  %v74_v18 = vadd.f32 %v73_v15, %v72_v13 }
  0x9d   :  { %898 = vpush %v65_v17  ;;  %v75_v19 = vrot.slane %v74_v18, 1 }
  0x9f   :  { %v76_v20 = vadd.f32 %v75_v19, %v74_v18 }
  0xa1   :  { %900 = vpush %v76_v20 }
  0xce   :  { %s899_s1 = spop %898 }
  0xcf   :  { %s78_s14 = smul.f32 0.00390625, %s899_s1 }
  0xd1   :  { %s80_s2 = smul.f32 %s78_s14, %s78_s14  ;;  %v82_v23 = vstv %s78_s14 }
  0xd2   :  { %s901_s15 = spop %900  ;;  %v83_v25 = vsub.f32 %v1065_v0, %v82_v23 }
  0xd3   :  { %s79_s16 = smul.f32 0.00390625, %s901_s15 }
  0xd5   :  { %s81_s17 = ssub.f32 %s79_s16, %s80_s2 }
  0xd7   :  { %s84_s18 = sadd.f32 1e-05, %s81_s17 }
  0xd9   :  { %v85_v21 = vstv %s84_s18 }
  0xda   :  { %934 = vrsqrt.f32 %v85_v21 }
  0xe4   :  { %v935_v22 = vpop.eup %934 }
  0xe5   :  { %902 = vpush %v935_v22 }
 0x116   :  { %s903_s19 = spop %902 }
 0x117   :  { %v88_v26 = vstv %s903_s19 }
 0x118   :  { %v89_v27 = vmul.f32 %v88_v26, %v83_v25 }
 0x11a   :  { %v95_v28 = vmul.f32 %v1078_v24, %v89_v27 }
 0x11c   :  { %v101_v30 = vadd.f32 %v1082_v29, %v95_v28 }
 0x11e   :  { %v784_v31 = vmul.f32 -1.442695, %v101_v30 }
 0x120   :  { %936 = vpow2.f32 %v784_v31 }
 0x12a   :  { %v937_v32 = vpop.eup %936 }
 0x12b   :  { %v105_v33 = vadd.f32 1.0, %v937_v32 }
 0x12d   :  { %938 = vrcp.f32 %v105_v33 }
 0x137   :  { %v939_v36 = vpop.eup %938 }
 0x138   :  { %v108_v37 = vmul.f32 %v939_v36, %v101_v30 }
 0x13a   :  { %115 = vrot.lane.b32.xlu1 %v108_v37, %s986_s20  ;;  %110 = vrot.lane.b32.xlu0 %v108_v37, %s987_s21 }
 0x13e   :  { %122 = vperm.xlu1 %932, %v50_v38  }
 0x1ac   :  { %v111_v39 = vpop.permute.xlu0 %110  ;;  %v116_v43 = vpop.permute.xlu1 %115 }
 0x1ad   :  { %v876_v41 = vpack.c.bf16 %v108_v37, %v111_v39 }
 0x1af   :  { %878 = vmatpush3.bf16.msk.msra.mxu0 %vm1096_vm5, %v876_v41  ;;  %v1139_v41 = vld [vmem:[%s1241_s11] sm:$0xff] }
 0x1b0   :  { %833 = vmatprep.subr.mxu0 %v985_v35 }
 0x1b3   :  { %834 = vmatpush3.msk.msra.mxu0 %vm118_vm6, %v116_v43 }
 0x1b4   :  { %836 = vmatmul.mubr.msk.f32.vlgmr.msra.gmra.mrb[0].mxu0 %vm125_vm7, %v1106_v42  ;;  %847 = vmatprep.subr.mxu0 %v985_v35 }
 0x1b5   :  { %848 = vmatpush3.msra.mxu0 %v1065_v0  ;;  %849 = vmatprep.mubr.msk.f32.mxu0 %vm984_vm1, %v985_v35 }
 0x1b6   :  { %883 = vmatprep.subr.bf16.mxu0 %v983_v34 }
 0x1b8   :  { %850 = vmatmul.mubr.msk.f32.vlgmr.msra.gmra.mrb[2].mxu0 %vm358_vm8, %v1139_v41 }
 0x1b9   :  { %858 = vmatprep.mubr.msk.f32.mxu0 %vm984_vm1, %v985_v35 }
 0x1bd   :  { %v1116_v44 = vpop.permute.xlu1 %122 }
 0x287   :  { %v195_v45 = vpop.f32.mrb[0].mxu0 }
 0x288   :  { %v196_v46 = vadd.f32 %v195_v45, %v1116_v44  ;;  %v837_v47 = vpop.f32.mrb[1].mxu0 }
 0x28a   :  { %v199_v49 = vsel %vm56_vm0, %v196_v46, 0.0  ;;  %v209_v50 = vmul.f32 %v196_v46, %v196_v46 }
 0x28b   :  { %200 = vadd.xlane.f32.xlu1 %v199_v49  ;;  %v1153_v47 = vpop.f32.mrb[2].mxu0 }
 0x28c   :  { %v210_v51 = vsel %vm56_vm0, %v209_v50, 0.0  ;;  %v851_v49 = vpop.f32.mrb[3].mxu0 }
 0x28d   :  { %211 = vadd.xlane.f32.xlu0 %v210_v51 }
 0x28f   :  { %437 = vadd.xlane.f32.xlu1 %v436_v52 }
 0x293   :  { %448 = vadd.xlane.f32.xlu1 %v447_v54 }
 0x318   :  { %v201_v55 = vpop.xlane.xlu1 %200 }
 0x319   :  { %v202_v56 = vrot.slane %v201_v55, 4 }
 0x31a   :  { %v212_v57 = vpop.xlane.xlu0 %211 }
 0x31b   :  { %v203_v58 = vadd.f32 %v202_v56, %v201_v55  ;;  %v213_v59 = vrot.slane %v212_v57, 4 }
 0x31c   :  { %v438_v5 = vpop.xlane.xlu1 %437 }
 0x31d   :  { %v204_v60 = vrot.slane %v203_v58, 2  ;;  %v214_v61 = vadd.f32 %v213_v59, %v212_v57  ;;  %v439_v7 = vrot.slane %v438_v5, 4  ;;  %v48_v57 = vld [vmem:[%s1236_s6] sm:$0xff]  ;;  %v801_v59 = vld [vmem:[%s1237_s7 + $0x8] sm:$0xff] }
 0x31f   :  { %v215_v62 = vrot.slane %v214_v61, 2  ;;  %v205_v63 = vadd.f32 %v204_v60, %v203_v58  ;;  %v440_v9 = vadd.f32 %v439_v7, %v438_v5  ;;  %v252_v58 = vld [vmem:[%s1238_s8] sm:$0xff]  ;;  %v594_v60 = vadd.f32 1.0, %v801_v59 }
 0x320   :  { %v449_v6 = vpop.xlane.xlu1 %448 }
 0x321   :  { %v206_v0 = vrot.slane %v205_v63, 1  ;;  %v216_v1 = vadd.f32 %v215_v62, %v214_v61  ;;  %v450_v8 = vrot.slane %v449_v6, 4  ;;  %v441_v11 = vrot.slane %v440_v9, 2  ;;  %v802_v61 = vld [vmem:[%s1238_s8 + $0x8] sm:$0xff] }
 0x323   :  { %v207_v2 = vadd.f32 %v206_v0, %v205_v63  ;;  %v217_v3 = vrot.slane %v216_v1, 1  ;;  %v451_v10 = vadd.f32 %v450_v8, %v449_v6  ;;  %v442_v14 = vadd.f32 %v441_v11, %v440_v9 }
 0x325   :  { %904 = vpush %v207_v2  ;;  %v218_v4 = vadd.f32 %v217_v3, %v216_v1  ;;  %v452_v13 = vrot.slane %v451_v10, 2  ;;  %v443_v16 = vrot.slane %v442_v14, 1 }
 0x327   :  { %906 = vpush %v218_v4  ;;  %v453_v15 = vadd.f32 %v452_v13, %v451_v10  ;;  %v444_v19 = vadd.f32 %v443_v16, %v442_v14 }
 0x329   :  { %v454_v17 = vrot.slane %v453_v15, 1 }
 0x32b   :  { %v455_v20 = vadd.f32 %v454_v17, %v453_v15 }
 0x356   :  { %s905_s0 = spop %904 }
 0x357   :  { %s220_s26 = smul.f32 0.00390625, %s905_s0 }
 0x358   :  { %s907_s27 = spop %906 }
 0x359   :  { %s222_s28 = smul.f32 %s220_s26, %s220_s26  ;;  %v224_v21 = vstv %s220_s26 }
 0x35a   :  { %s221_s29 = smul.f32 0.00390625, %s907_s27  ;;  %v225_v22 = vsub.f32 %v196_v46, %v224_v21 }
 0x35c   :  { %s223_s30 = ssub.f32 %s221_s29, %s222_s28 }
 0x35e   :  { %s226_s1 = sadd.f32 1e-05, %s223_s30 }
 0x360   :  { %v227_v12 = vstv %s226_s1 }
 0x361   :  { %940 = vrsqrt.f32 %v227_v12 }
 0x36b   :  { %v941_v18 = vpop.eup %940 }
 0x36c   :  { %908 = vpush %v941_v18 }
 0x36d   :  { %910 = vpush %v444_v19 }
 0x36e   :  { %912 = vpush %v455_v20 }
 0x39d   :  { %s909_s14 = spop %908 }
 0x39e   :  { %v230_v23 = vstv %s909_s14  ;;  %s911_s2 = spop %910 }
 0x39f   :  { %v1131_v25 = vmul.f32 %v230_v23, %v225_v22  ;;  %s457_s15 = smul.f32 0.00390625, %s911_s2  ;;  %s913_s16 = spop %912 }
 0x3a0   :  { %s458_s17 = smul.f32 0.00390625, %s913_s16 }
 0x3a1   :  { %s459_s18 = smul.f32 %s457_s15, %s457_s15  ;;  %v461_v28 = vstv %s457_s15 }
 0x3a2   :  { %v462_v30 = vsub.f32 %v1122_v48, %v461_v28 }
 0x3a3   :  { %s460_s19 = ssub.f32 %s458_s17, %s459_s18 }
 0x3a5   :  { %s463_s22 = sadd.f32 1e-05, %s460_s19 }
 0x3a7   :  { %v464_v26 = vstv %s463_s22 }
 0x3a8   :  { %942 = vrsqrt.f32 %v464_v26 }
 0x3b2   :  { %v943_v27 = vpop.eup %942 }
 0x3b3   :  { %914 = vpush %v943_v27 }
 0x3e4   :  { %s915_s23 = spop %914 }
 0x3e5   :  { %v467_v31 = vstv %s915_s23 }
 0x3e6   :  { %v468_v32 = vmul.f32 %v467_v31, %v462_v30 }
 0x3e8   :  { %v469_v33 = vmul.f32 %v468_v32, %v1078_v24 }
 0x3ea   :  { %v470_v36 = vadd.f32 %v469_v33, %v1082_v29 }
 0x3ec   :  { %v796_v37 = vmul.f32 -1.442695, %v470_v36 }
 0x3ee   :  { %944 = vpow2.f32 %v796_v37 }
 0x3f8   :  { %v945_v38 = vpop.eup %944 }
 0x3f9   :  { %v474_v39 = vadd.f32 1.0, %v945_v38 }
 0x3fb   :  { %946 = vrcp.f32 %v474_v39 }
 0x405   :  { %v947_v24 = vpop.eup %946 }
 0x406   :  { %v477_v43 = vmul.f32 %v947_v24, %v470_v36 }
 0x408   :  { %483 = vrot.lane.b32.xlu0 %v477_v43, %s986_s20  ;;  %479 = vrot.lane.b32.xlu1 %v477_v43, %s987_s21 }
 0x47a   :  { %v480_v29 = vpop.permute.xlu1 %479  ;;  %v484_v46 = vpop.permute.xlu0 %483 }
 0x47b   :  { %v884_v45 = vpack.c.bf16 %v477_v43, %v480_v29 }
 0x47d   :  { %886 = vmatpush3.bf16.msk.msra.mxu0 %vm1096_vm5, %v884_v45 }
 0x47e   :  { %856 = vmatprep.subr.mxu0 %v985_v35 }
 0x481   :  { %857 = vmatpush3.msk.msra.mxu0 %vm118_vm6, %v484_v46 }
 0x482   :  { %859 = vmatmul.mubr.msk.f32.vlgmr.msra.gmra.mrb[4].mxu0 %vm125_vm7, %v1106_v42  ;;  %v47_v42 = vld [vmem:[%s1235_s5] sm:$0xff] }
 0x555   :  { %v553_v50 = vpop.f32.mrb[4].mxu0 }
 0x556   :  { %v1156_v51 = vadd.f32 %v553_v50, %v1116_v44  ;;  %v860_v52 = vpop.f32.mrb[5].mxu0  ;;  %v244_v44 = vld [vmem:[%s1237_s7] sm:$0xff] }
 0x557   :  { %v245_v56 = vadd.f32 1.0, %v244_v44  ;;  %v51_v50 = vld [vmem:[%s1239_s9] sm:$0xff] }
 0x558   :  { %v557_v53 = vsel %vm56_vm0, %v1156_v51, 0.0  ;;  %v567_v54 = vmul.f32 %v1156_v51, %v1156_v51 }
 0x559   :  { %558 = vadd.xlane.f32.xlu1 %v557_v53 }
 0x55a   :  { %v568_v55 = vsel %vm56_vm0, %v567_v54, 0.0  ;;  %v54_v54 = vld [vmem:[%s1242_s12] sm:$0xff] }
 0x55b   :  { %569 = vadd.xlane.f32.xlu0 %v568_v55  ;;  %v52_v55 = vld [vmem:[%s1240_s10] sm:$0xff]  ;;  %s989_s10 = smov [#allocation2]  }
 0x55c   :  { %s773_s12 = sshll.u32 %s989_s10, 4  ;;  %s774_s12 = int_to_ptr.vmem [resolvable:$true] %s773_s12 }
 0x55d   :  { %p963_p1 = scmp.lt.s32.totalorder %s774_s12, %s774_s12 }
 0x56a   :  { %234 = vperm.xlu1 %932, %v47_v42  }
 0x56e   :  { %248 = vperm.xlu1 %932, %v245_v56  }
 0x571   :  { %240 = vperm.xlu0 %933, %v48_v57  }
 0x572   :  { %255 = vperm.xlu1 %932, %v252_v58  }
 0x576   :  { %597 = vperm.xlu1 %932, %v594_v60  }
 0x57a   :  { %605 = vperm.xlu1 %932, %v802_v61  }
 0x5e6   :  { %v559_v62 = vpop.xlane.xlu1 %558 }
 0x5e7   :  { %v560_v63 = vrot.slane %v559_v62, 4 }
 0x5e8   :  { %v570_v0 = vpop.xlane.xlu0 %569 }
 0x5e9   :  { %v561_v1 = vadd.f32 %v560_v63, %v559_v62  ;;  %v571_v2 = vrot.slane %v570_v0, 4 }
 0x5ea   :  { %v235_v3 = vpop.permute.xlu1 %234 }
 0x5eb   :  { %v562_v4 = vrot.slane %v561_v1, 2  ;;  %v572_v5 = vadd.f32 %v571_v2, %v570_v0  ;;  %v237_v9 = vmul.f32 %v235_v3, %v1131_v25 }
 0x5ed   :  { %v573_v6 = vrot.slane %v572_v5, 2  ;;  %v563_v7 = vadd.f32 %v562_v4, %v561_v1 }
 0x5ee   :  { %v249_v8 = vpop.permute.xlu1 %248 }
 0x5ef   :  { %v564_v10 = vrot.slane %v563_v7, 1  ;;  %v574_v11 = vadd.f32 %v573_v6, %v572_v5 }
 0x5f0   :  { %v241_v12 = vpop.permute.xlu0 %240 }
 0x5f1   :  { %v243_v13 = vadd.f32 %v241_v12, %v237_v9  ;;  %v565_v14 = vadd.f32 %v564_v10, %v563_v7  ;;  %v575_v15 = vrot.slane %v574_v11, 1 }
 0x5f2   :  { %v256_v18 = vpop.permute.xlu1 %255 }
 0x5f3   :  { %v251_v16 = vmul.f32 %v249_v8, %v243_v13  ;;  %916 = vpush %v565_v14  ;;  %v576_v17 = vadd.f32 %v575_v15, %v574_v11 }
 0x5f5   :  { %v258_v19 = vadd.f32 %v256_v18, %v251_v16  ;;  %918 = vpush %v576_v17 }
 0x5f6   :  { %v598_v33 = vpop.permute.xlu1 %597 }
 0x5f7   :  { %v789_v20 = vmul.f32 -1.442695, %v258_v19 }
 0x5f9   :  { %948 = vpow2.f32 %v789_v20 }
 0x5fa   :  { %v606_v39 = vpop.permute.xlu1 %605 }
 0x603   :  { %v949_v21 = vpop.eup %948 }
 0x604   :  { %v262_v22 = vadd.f32 1.0, %v949_v21 }
 0x606   :  { %950 = vrcp.f32 %v262_v22 }
 0x610   :  { %v951_v23 = vpop.eup %950 }
 0x611   :  { %v265_v26 = vmul.f32 %v951_v23, %v258_v19 }
 0x613   :  { %267 = vrot.lane.b32.xlu1 %v265_v26, %s987_s21 }
 0x617   :  { %271 = vrot.lane.b32.xlu1 %v265_v26, %s986_s20 }
 0x624   :  { %s917_s6 = spop %916 }
 0x625   :  { %s578_s7 = smul.f32 0.00390625, %s917_s6 }
 0x626   :  { %s919_s8 = spop %918 }
 0x627   :  { %s580_s2 = smul.f32 %s578_s7, %s578_s7  ;;  %v582_v28 = vstv %s578_s7 }
 0x628   :  { %s579_s15 = smul.f32 0.00390625, %s919_s8  ;;  %v583_v30 = vsub.f32 %v1156_v51, %v582_v28 }
 0x62a   :  { %s581_s16 = ssub.f32 %s579_s15, %s580_s2 }
 0x62c   :  { %s584_s17 = sadd.f32 1e-05, %s581_s16 }
 0x62e   :  { %v585_v25 = vstv %s584_s17 }
 0x62f   :  { %952 = vrsqrt.f32 %v585_v25 }
 0x639   :  { %v953_v27 = vpop.eup %952 }
 0x63a   :  { %920 = vpush %v953_v27 }
 0x66b   :  { %s921_s18 = spop %920 }
 0x66c   :  { %v588_v31 = vstv %s921_s18 }
 0x66d   :  { %v589_v32 = vmul.f32 %v588_v31, %v583_v30 }
 0x66f   :  { %v590_v36 = vmul.f32 %v589_v32, %v235_v3 }
 0x671   :  { %v591_v37 = vadd.f32 %v590_v36, %v241_v12 }
 0x673   :  { %v600_v38 = vmul.f32 %v598_v33, %v591_v37 }
 0x675   :  { %v608_v24 = vadd.f32 %v606_v39, %v600_v38 }
 0x677   :  { %v803_v43 = vmul.f32 -1.442695, %v608_v24 }
 0x679   :  { %954 = vpow2.f32 %v803_v43 }
 0x683   :  { %v955_v29 = vpop.eup %954 }
 0x684   :  { %v612_v45 = vadd.f32 1.0, %v955_v29 }
 0x685   :  { %v268_v46 = vpop.permute.xlu1 %267 }
 0x686   :  { %v880_v49 = vpack.c.bf16 %v265_v26, %v268_v46  ;;  %956 = vrcp.f32 %v612_v45 }
 0x688   :  { %882 = vmatpush3.bf16.msk.msra.mxu1 %vm1096_vm5, %v880_v49 }
 0x689   :  { %842 = vmatprep.subr.mxu1 %v985_v35  ;;  %v272_v51 = vpop.permute.xlu1 %271 }
 0x68c   :  { %843 = vmatpush3.msk.msra.mxu1 %vm118_vm6, %v272_v51 }
 0x68d   :  { %845 = vmatmul.mubr.msk.f32.vlgmr.msra.gmra.mrb[0].mxu1 %vm125_vm7, %v51_v50  ;;  %887 = vmatprep.subr.bf16.mxu1 %v983_v34 }
 0x68e   :  { %867 = vmatprep.mubr.msk.f32.mxu1 %vm984_vm1, %v985_v35 }
 0x690   :  { %v957_v52 = vpop.eup %956 }
 0x691   :  { %v615_v53 = vmul.f32 %v957_v52, %v608_v24 }
 0x693   :  { %621 = vrot.lane.b32.xlu0 %v615_v53, %s986_s20  ;;  %617 = vrot.lane.b32.xlu1 %v615_v53, %s987_s21  ;;  %s958_s20 = scalar_lea.vmem %s774_s12, 256 }
 0x694   :  { %p959_p0 = scmp.ne.s32.totalorder %s774_s12, %s958_s20  ;;  %p964_p2 = scmp.lt.s32.totalorder %s958_s20, %s958_s20 }
 0x696   :  { %p965_p3 = por %p964_p2, %p963_p1 }
 0x697   :  { %355 = vperm.xlu0 %933, %v54_v54   ;;  %277 = vperm.xlu1 %932, %v52_v55  }
 0x698   :  { %p966_p4 = pnand %p965_p3, %p959_p0 }
 0x705   :  { %v618_v34 = vpop.permute.xlu1 %617  ;;  %v622_v44 = vpop.permute.xlu0 %621 }
 0x706   :  { %v888_v42 = vpack.c.bf16 %v615_v53, %v618_v34 }
 0x708   :  { %890 = vmatpush3.bf16.msk.msra.mxu1 %vm1096_vm5, %v888_v42 }
 0x709   :  { %865 = vmatprep.subr.mxu1 %v985_v35 }
 0x70c   :  { %866 = vmatpush3.msk.msra.mxu1 %vm118_vm6, %v622_v44 }
 0x70d   :  { %868 = vmatmul.mubr.msk.f32.vlgmr.msra.gmra.mrb[2].mxu1 %vm125_vm7, %v51_v50  ;;  %870 = vmatprep.subr.mxu1 %v985_v35 }
 0x70e   :  { %871 = vmatpush3.msra.mxu1 %v1122_v48  ;;  %872 = vmatprep.mubr.msk.f32.mxu1 %vm984_vm1, %v985_v35 }
 0x715   :  { %873 = vmatmul.mubr.msk.f32.vlgmr.msra.gmra.mrb[2].mxu1 %vm358_vm8, %v1139_v41 }
 0x716   :  { %v278_v56 = vpop.permute.xlu1 %277  ;;  %v356_v59 = vpop.permute.xlu0 %355 }
 0x717   :  { %v894_v62 = vadd.f32 %v356_v59, %v278_v56 }
 0x760   :  { %v349_v40 = vpop.f32.mrb[0].mxu1 }
 0x761   :  { %v350_v57 = vadd.f32 %v349_v40, %v278_v56  ;;  %v846_v58 = vpop.f32.mrb[1].mxu1 }
 0x763   :  { %v892_v60 = vadd.f32 %v356_v59, %v350_v57 }
 0x765   :  { %v893_v61 = vadd.f32 %v892_v60, %v1153_v47 }
 0x767   :  { %433 = vst.msk [vmem:[#allocation2] sm:$0xff] %vm56_vm0, %v893_v61 }
 0x7e8   :  { %v761_v48 = vpop.f32.mrb[2].mxu1 }
 0x7e9   :  { %v895_v63 = vadd.f32 %v894_v62, %v761_v48  ;;  %v874_v35 = vpop.f32.mrb[3].mxu1 }
 0x7eb   :  { %767 = vst.msk [vmem:[#allocation2 + $0x8] sm:$0xff] %vm56_vm0, %v895_v63 }
 0x7ec   :  { %969 = shalt.err (!%p966_p4)
}
 0x7ed   :  { %s970_s3 = scalar_lea.hbm %s1243_s13, 256 }
 0x7ee   :  { %p971_p5 = scmp.ne.s32.totalorder %s1243_s13, %s970_s3  ;;  %p974_p6 = scmp.lt.u32.totalorder %s970_s3, %s1243_s13 }
 0x7f0   :  { %p976_p7 = pnand %p974_p6, %p971_p5 }
 0x7f2   :  { %979 = shalt.err (!%p976_p7)
}
 0x7f3   :  { %s990_s28 = smov 128   ;;  %s991_s29 = smov 8  }
 0x7f4   :  { %779 = dma.vmem_to_hbm [thread:$0]  %s774_s12, 256, %s1243_s13, [#allocation3], %s990_s28, %s990_s28, %s991_s29  }
 0x7f5   :  { %980 = dma.done.wait [#allocation3], 256  }
 0x7f6   :  { %981 = vsyncadd [#allocation3], 4294967040 }
 0x7f7   :  { %783 = vsyncpa [#allocation3], 1 }

</bundles_post_ra>
